<compile_context>
chip_gen: v7x
topology: tpu7x:2x2x1
jax: 0.10.0
libtpu: 0.0.40
codegen_flags: <defaults>
</compile_context>

<pallas_src>
import functools
import math

import jax
import jax.numpy as jnp
from jax.experimental import pallas as pl
from jax.experimental.pallas import tpu as pltpu


BN_EPS = 1e-5
LANE = 128            # lane width (last dim alignment)
SUBLANE = 8           # sublane width (second-to-last dim alignment)
MAX_BATCH_TILE = 512  # batch tile for the non-BN (grid) path


def _round_up(x, m):
    return (x + m - 1) // m * m


def _vmem_cap_bytes():
    """Physical VMEM per core minus headroom; generation-aware, safe fallback."""
    try:
        cap = int(pltpu.get_tpu_info().vmem_capacity_bytes)
    except Exception:
        cap = 64 << 20          # safe on every generation (v7x has 64 MiB)
    return max(cap - (8 << 20), 32 << 20)


# ---------------------------------------------------------------------------
# Fused MLP kernel: runs every layer back-to-back with the activation held in
# VMEM/vregs.  `layer_meta` is static (Python), so the layer loop unrolls.
# ---------------------------------------------------------------------------
def _fused_mlp_kernel(*refs, layer_meta, n_real, n_rows, eps, compute_dtype):
    x_ref = refs[0]
    o_ref = refs[-1]
    params = refs[1:-1]

    h = x_ref[...]                                  # bf16 activation

    any_bn = any(m["bn"] for m in layer_meta)
    need_mask = any_bn and (n_rows != n_real)
    if need_mask:
        # padded batch rows must not pollute BN statistics
        row_ids = jax.lax.broadcasted_iota(jnp.int32, (n_rows, 1), 0)
        row_mask = (row_ids < n_real).astype(jnp.float32)

    inv_n = jnp.float32(1.0 / n_real)
    n_layers = len(layer_meta)
    idx = 0
    for li, m in enumerate(layer_meta):
        w_ref = params[idx]
        idx += 1
        # MXU matmul in bf16 with f32 accumulation.
        y = jnp.dot(
            h.astype(compute_dtype),
            w_ref[...].astype(compute_dtype),
            preferred_element_type=jnp.float32,
        )
        if m["bias"]:
            b_ref = params[idx]
            idx += 1
            y = y + b_ref[...]
        if m["bn"]:
            g_ref = params[idx]
            idx += 1
            bt_ref = params[idx]
            idx += 1
            # First layer: padded input rows are zero and bias is elided under
            # BN, so the matmul already produced zero padded rows -> skip mask.
            if need_mask and li > 0:
                y = y * row_mask
            # Two-pass (centered) statistics: matches the reference and avoids
            # E[y^2]-E[y]^2 cancellation.
            mean = jnp.sum(y, axis=0, keepdims=True) * inv_n
            yc = y - mean
            yc_stat = yc * row_mask if need_mask else yc
            var = jnp.sum(yc_stat * yc_stat, axis=0, keepdims=True) * inv_n
            y = yc * jax.lax.rsqrt(var + eps)
            y = y * g_ref[...] + bt_ref[...]
        if m["relu"]:
            y = jnp.maximum(y, 0.0)
        # Keep the live inter-layer activation in bf16 (only consumer is the
        # next matmul's bf16 cast); the final layer output stays f32.
        h = y if li == n_layers - 1 else y.astype(compute_dtype)

    o_ref[...] = h.astype(o_ref.dtype)


# ---------------------------------------------------------------------------
# ProjectionMLP in JAX / Pallas
# ---------------------------------------------------------------------------
class ProjectionMLP:
    """Pallas port of ProjectionMLP.

    Layer stack:
      Linear(dim_in, hidden)  [+ BN1d] + ReLU
      (num_layers - 2) x [ Linear(hidden, hidden) [+ BN1d] + ReLU ]
      Linear(hidden, feat_dim)                     (no BN, no ReLU)
    """

    def __init__(self, dim_in, hidden_dim, feat_dim, batch_norm, num_layers, key,
                 compute_dtype=jnp.bfloat16):
        self.batch_norm = bool(batch_norm)
        self.compute_dtype = compute_dtype
        self.layers = []

        dims = [(dim_in, hidden_dim)]
        dims += [(hidden_dim, hidden_dim)] * (num_layers - 2)
        dims += [(hidden_dim, feat_dim)]

        for li, (d_in, d_out) in enumerate(dims):
            key, kw, kb = jax.random.split(key, 3)
            # PyTorch nn.Linear default init: U(-1/sqrt(d_in), 1/sqrt(d_in)).
            bound = 1.0 / math.sqrt(d_in)
            w = jax.random.uniform(kw, (d_out, d_in), jnp.float32, -bound, bound)
            b = jax.random.uniform(kb, (d_out,), jnp.float32, -bound, bound)

            is_last = li == len(dims) - 1
            has_bn = self.batch_norm and not is_last
            has_relu = not is_last

            d_in_p = _round_up(d_in, LANE)
            d_out_p = _round_up(d_out, LANE)

            # weight pre-transposed to (d_in, d_out), zero-padded, bf16 for MXU
            w_t_pad = jnp.zeros((d_in_p, d_out_p), jnp.float32)
            w_t_pad = w_t_pad.at[:d_in, :d_out].set(w.T).astype(compute_dtype)
            b_pad = jnp.zeros((1, d_out_p), jnp.float32).at[:, :d_out].set(b)

            layer = dict(
                d_in=d_in, d_out=d_out, d_in_p=d_in_p, d_out_p=d_out_p,
                w=w, b=b,                      # unpadded f32 copies (reference)
                w_t_pad=w_t_pad, b_pad=b_pad,
                bn=has_bn, relu=has_relu,
                # bias is mathematically cancelled by the BN mean subtraction
                bias=(not has_bn),
            )
            if has_bn:
                gamma = jnp.ones((d_out,), jnp.float32)
                beta = jnp.zeros((d_out,), jnp.float32)
                layer["gamma"] = gamma
                layer["beta"] = beta
                layer["gamma_pad"] = (
                    jnp.ones((1, d_out_p), jnp.float32).at[:, :d_out].set(gamma))
                layer["beta_pad"] = (
                    jnp.zeros((1, d_out_p), jnp.float32).at[:, :d_out].set(beta))
            self.layers.append(layer)

        # jit fuses the host-side pad/cast and output slice around the kernel
        # and removes per-op dispatch overhead; re-traces per input shape.
        self._forward = jax.jit(self._forward_impl)

    def __call__(self, x):
        return self._forward(x)

    def _forward_impl(self, x):
        n, d_in = x.shape
        assert d_in == self.layers[0]["d_in"], (d_in, self.layers[0]["d_in"])
        d_in_p = self.layers[0]["d_in_p"]
        feat = self.layers[-1]["d_out"]
        feat_p = self.layers[-1]["d_out_p"]
        cdt = self.compute_dtype

        if self.batch_norm:
            # BN reduces over the batch -> whole (padded) batch in one block.
            tb = _round_up(n, SUBLANE)
            nt = 1
        else:
            # No cross-row reduction -> tile the batch over a parallel grid.
            tb = min(_round_up(n, SUBLANE), MAX_BATCH_TILE)
            nt = pl.cdiv(n, tb)
        n_p = tb * nt

        # Pad + downcast the input on the host (bf16): halves input DMA bytes.
        x_p = jnp.zeros((n_p, d_in_p), cdt).at[:n, :d_in].set(x.astype(cdt))

        # Constant operands (weights, bias, gamma, beta): full-array VMEM,
        # loaded once, no pipeline double-buffering.
        full_vmem = pl.BlockSpec(memory_space=pltpu.MemorySpace.VMEM)

        args = [x_p]
        if nt == 1:
            # Single step: no grid, no double-buffering of the big blocks.
            in_specs = [full_vmem]
            out_spec = full_vmem
        else:
            in_specs = [pl.BlockSpec((tb, d_in_p), lambda i: (i, 0))]
            out_spec = pl.BlockSpec((tb, feat_p), lambda i: (i, 0))

        layer_meta = []
        flops = 0
        transcendentals = 0
        for layer in self.layers:
            args.append(layer["w_t_pad"])
            in_specs.append(full_vmem)
            if layer["bias"]:
                args.append(layer["b_pad"])
                in_specs.append(full_vmem)
            if layer["bn"]:
                args.append(layer["gamma_pad"])
                in_specs.append(full_vmem)
                args.append(layer["beta_pad"])
                in_specs.append(full_vmem)
                transcendentals += layer["d_out_p"]          # rsqrt per column
            layer_meta.append(
                dict(bias=layer["bias"], bn=layer["bn"], relu=layer["relu"]))
            flops += 2 * n_p * layer["d_in_p"] * layer["d_out_p"]

        # Resident-footprint based VMEM budget, clamped by physical VMEM.
        weight_bytes = sum(int(a.size) * a.dtype.itemsize for a in args[1:])
        buf_factor = 1 if nt == 1 else 2      # double-buffer only blocked refs
        resident = weight_bytes
        resident += int(x_p.size // nt) * x_p.dtype.itemsize * buf_factor
        resident += tb * feat_p * 4 * buf_factor
        max_d = max([d_in_p] + [l["d_out_p"] for l in self.layers])
        resident += 4 * tb * max_d * 4        # f32 working copies of activation
        vmem_limit = min(_vmem_cap_bytes(),
                         max(resident + (4 << 20), 32 << 20))

        bytes_accessed = (int(x_p.size) * x_p.dtype.itemsize + weight_bytes
                          + n_p * feat_p * 4)

        kernel = functools.partial(
            _fused_mlp_kernel,
            layer_meta=tuple(layer_meta),
            n_real=n,
            n_rows=tb,
            eps=BN_EPS,
            compute_dtype=cdt,
        )

        call_kwargs = dict(
            out_shape=jax.ShapeDtypeStruct((n_p, feat_p), jnp.float32),
            in_specs=in_specs,
            out_specs=out_spec,
            cost_estimate=pl.CostEstimate(
                flops=flops,
                transcendentals=transcendentals,
                bytes_accessed=bytes_accessed,
            ),
        )
        if nt == 1:
            call_kwargs["compiler_params"] = pltpu.CompilerParams(
                vmem_limit_bytes=vmem_limit)
        else:
            call_kwargs["grid"] = (nt,)
            call_kwargs["compiler_params"] = pltpu.CompilerParams(
                dimension_semantics=("parallel",),
                vmem_limit_bytes=vmem_limit)

        out_p = pl.pallas_call(kernel, **call_kwargs)(*args)
        return out_p[:n, :feat]


# ---------------------------------------------------------------------------
# Pure-JAX reference (PyTorch semantics: bias always added, two-pass BN stats).
# Matmul operands are cast to the same compute dtype as the kernel so the
# comparison isolates implementation differences rather than bf16 rounding.
# ---------------------------------------------------------------------------
def reference_forward(x, mlp):
    cdt = mlp.compute_dtype
    h = x.astype(jnp.float32)
    for layer in mlp.layers:
        y = jnp.dot(h.astype(cdt), layer["w"].T.astype(cdt),
                    preferred_element_type=jnp.float32) + layer["b"][None, :]
        if layer["bn"]:
            mean = jnp.mean(y, axis=0, keepdims=True)
            var = jnp.mean((y - mean) ** 2, axis=0, keepdims=True)
            y = (y - mean) * jax.lax.rsqrt(var + BN_EPS)
            y = y * layer["gamma"][None, :] + layer["beta"][None, :]
        if layer["relu"]:
            y = jnp.maximum(y, 0.0)
        h = y
    return h


if __name__ == "__main__":
    key = jax.random.PRNGKey(0)

    configs = [
        # primary demo config (matches the module's intended use)
        dict(batch=8, dim_in=32, hidden=32, feat=16, num_layers=3, batch_norm=True),
        # batch not a multiple of 8 -> exercises padded-row masking in BN stats
        dict(batch=12, dim_in=32, hidden=32, feat=16, num_layers=3, batch_norm=True),
        # no BN, large batch -> exercises the batch-tiled parallel-grid path
        dict(batch=520, dim_in=32, hidden=32, feat=16, num_layers=3, batch_norm=False),
    ]

    for cfg in configs:
        key, kx, kp = jax.random.split(key, 3)
        x = jax.random.normal(kx, (cfg["batch"], cfg["dim_in"]), jnp.float32)
        mlp = ProjectionMLP(cfg["dim_in"], cfg["hidden"], cfg["feat"],
                            batch_norm=cfg["batch_norm"],
                            num_layers=cfg["num_layers"], key=kp)

        out = jax.block_until_ready(mlp(x))
        expected = reference_forward(x, mlp)

        assert out.shape == (cfg["batch"], cfg["feat"]), (out.shape, cfg)
        max_err = float(jnp.max(jnp.abs(out - expected)))
        assert jnp.allclose(out, expected, atol=1e-2, rtol=1e-2), (cfg, max_err)

    print("KERNEL_OK")
</pallas_src>

<mosaic_0001>
module attributes {stable_mosaic.version = 11 : i64} {
  func.func @_fused_mlp_kernel(%arg0: memref<8x128xbf16, #tpu.memory_space<vmem>>, %arg1: memref<128x128xbf16, #tpu.memory_space<vmem>>, %arg2: memref<1x128xf32, #tpu.memory_space<vmem>>, %arg3: memref<1x128xf32, #tpu.memory_space<vmem>>, %arg4: memref<128x128xbf16, #tpu.memory_space<vmem>>, %arg5: memref<1x128xf32, #tpu.memory_space<vmem>>, %arg6: memref<1x128xf32, #tpu.memory_space<vmem>>, %arg7: memref<128x128xbf16, #tpu.memory_space<vmem>>, %arg8: memref<1x128xf32, #tpu.memory_space<vmem>>, %arg9: memref<8x128xf32, #tpu.memory_space<vmem>>) attributes {dimension_semantics = [], scalar_prefetch = 0 : i64, scratch_operands = 0 : i64, tpu.core_type = #tpu.core_type<tc>} {
    %c0 = arith.constant 0 : index
    %c0_0 = arith.constant 0 : index
    %0 = vector.load %arg0[%c0, %c0_0] : memref<8x128xbf16, #tpu.memory_space<vmem>>, vector<8x128xbf16>
    %c0_1 = arith.constant 0 : index
    %c0_2 = arith.constant 0 : index
    %1 = vector.load %arg1[%c0_1, %c0_2] : memref<128x128xbf16, #tpu.memory_space<vmem>>, vector<128x128xbf16>
    %cst = arith.constant dense<0.000000e+00> : vector<8x128xf32>
    %2 = tpu.matmul %0, %1, %cst {dimension_numbers = #tpu.dot_dimension_numbers<[1], [0], [0], [1], [0, 0, 1, 1], [], []>} : vector<8x128xbf16>, vector<128x128xbf16>, vector<8x128xf32> -> vector<8x128xf32>
    %cst_3 = arith.constant dense<0.000000e+00> : vector<128xf32>
    %3 = vector.multi_reduction <add>, %2, %cst_3 [0] : vector<8x128xf32> to vector<128xf32>
    %4 = vector.shape_cast %3 : vector<128xf32> to vector<1x128xf32>
    %cst_4 = arith.constant 1.250000e-01 : f32
    %5 = vector.broadcast %cst_4 : f32 to vector<1x128xf32>
    %6 = arith.mulf %4, %5 : vector<1x128xf32>
    %7 = vector.broadcast %6 : vector<1x128xf32> to vector<8x128xf32>
    %8 = arith.subf %2, %7 : vector<8x128xf32>
    %9 = arith.mulf %8, %8 : vector<8x128xf32>
    %cst_5 = arith.constant dense<0.000000e+00> : vector<128xf32>
    %10 = vector.multi_reduction <add>, %9, %cst_5 [0] : vector<8x128xf32> to vector<128xf32>
    %11 = vector.shape_cast %10 : vector<128xf32> to vector<1x128xf32>
    %cst_6 = arith.constant 1.250000e-01 : f32
    %12 = vector.broadcast %cst_6 : f32 to vector<1x128xf32>
    %13 = arith.mulf %11, %12 : vector<1x128xf32>
    %cst_7 = arith.constant 9.99999974E-6 : f32
    %14 = vector.broadcast %cst_7 : f32 to vector<1x128xf32>
    %15 = arith.addf %13, %14 : vector<1x128xf32>
    %16 = math.rsqrt %15 : vector<1x128xf32>
    %17 = vector.broadcast %16 : vector<1x128xf32> to vector<8x128xf32>
    %18 = arith.mulf %8, %17 : vector<8x128xf32>
    %c0_8 = arith.constant 0 : index
    %c0_9 = arith.constant 0 : index
    %19 = vector.load %arg2[%c0_8, %c0_9] : memref<1x128xf32, #tpu.memory_space<vmem>>, vector<1x128xf32>
    %20 = vector.broadcast %19 : vector<1x128xf32> to vector<8x128xf32>
    %21 = arith.mulf %18, %20 : vector<8x128xf32>
    %c0_10 = arith.constant 0 : index
    %c0_11 = arith.constant 0 : index
    %22 = vector.load %arg3[%c0_10, %c0_11] : memref<1x128xf32, #tpu.memory_space<vmem>>, vector<1x128xf32>
    %23 = vector.broadcast %22 : vector<1x128xf32> to vector<8x128xf32>
    %24 = arith.addf %21, %23 : vector<8x128xf32>
    %cst_12 = arith.constant 0.000000e+00 : f32
    %25 = vector.broadcast %cst_12 : f32 to vector<8x128xf32>
    %26 = arith.maximumf %24, %25 : vector<8x128xf32>
    %27 = arith.truncf %26 : vector<8x128xf32> to vector<8x128xbf16>
    %c0_13 = arith.constant 0 : index
    %c0_14 = arith.constant 0 : index
    %28 = vector.load %arg4[%c0_13, %c0_14] : memref<128x128xbf16, #tpu.memory_space<vmem>>, vector<128x128xbf16>
    %cst_15 = arith.constant dense<0.000000e+00> : vector<8x128xf32>
    %29 = tpu.matmul %27, %28, %cst_15 {dimension_numbers = #tpu.dot_dimension_numbers<[1], [0], [0], [1], [0, 0, 1, 1], [], []>} : vector<8x128xbf16>, vector<128x128xbf16>, vector<8x128xf32> -> vector<8x128xf32>
    %cst_16 = arith.constant dense<0.000000e+00> : vector<128xf32>
    %30 = vector.multi_reduction <add>, %29, %cst_16 [0] : vector<8x128xf32> to vector<128xf32>
    %31 = vector.shape_cast %30 : vector<128xf32> to vector<1x128xf32>
    %cst_17 = arith.constant 1.250000e-01 : f32
    %32 = vector.broadcast %cst_17 : f32 to vector<1x128xf32>
    %33 = arith.mulf %31, %32 : vector<1x128xf32>
    %34 = vector.broadcast %33 : vector<1x128xf32> to vector<8x128xf32>
    %35 = arith.subf %29, %34 : vector<8x128xf32>
    %36 = arith.mulf %35, %35 : vector<8x128xf32>
    %cst_18 = arith.constant dense<0.000000e+00> : vector<128xf32>
    %37 = vector.multi_reduction <add>, %36, %cst_18 [0] : vector<8x128xf32> to vector<128xf32>
    %38 = vector.shape_cast %37 : vector<128xf32> to vector<1x128xf32>
    %cst_19 = arith.constant 1.250000e-01 : f32
    %39 = vector.broadcast %cst_19 : f32 to vector<1x128xf32>
    %40 = arith.mulf %38, %39 : vector<1x128xf32>
    %cst_20 = arith.constant 9.99999974E-6 : f32
    %41 = vector.broadcast %cst_20 : f32 to vector<1x128xf32>
    %42 = arith.addf %40, %41 : vector<1x128xf32>
    %43 = math.rsqrt %42 : vector<1x128xf32>
    %44 = vector.broadcast %43 : vector<1x128xf32> to vector<8x128xf32>
    %45 = arith.mulf %35, %44 : vector<8x128xf32>
    %c0_21 = arith.constant 0 : index
    %c0_22 = arith.constant 0 : index
    %46 = vector.load %arg5[%c0_21, %c0_22] : memref<1x128xf32, #tpu.memory_space<vmem>>, vector<1x128xf32>
    %47 = vector.broadcast %46 : vector<1x128xf32> to vector<8x128xf32>
    %48 = arith.mulf %45, %47 : vector<8x128xf32>
    %c0_23 = arith.constant 0 : index
    %c0_24 = arith.constant 0 : index
    %49 = vector.load %arg6[%c0_23, %c0_24] : memref<1x128xf32, #tpu.memory_space<vmem>>, vector<1x128xf32>
    %50 = vector.broadcast %49 : vector<1x128xf32> to vector<8x128xf32>
    %51 = arith.addf %48, %50 : vector<8x128xf32>
    %cst_25 = arith.constant 0.000000e+00 : f32
    %52 = vector.broadcast %cst_25 : f32 to vector<8x128xf32>
    %53 = arith.maximumf %51, %52 : vector<8x128xf32>
    %54 = arith.truncf %53 : vector<8x128xf32> to vector<8x128xbf16>
    %c0_26 = arith.constant 0 : index
    %c0_27 = arith.constant 0 : index
    %55 = vector.load %arg7[%c0_26, %c0_27] : memref<128x128xbf16, #tpu.memory_space<vmem>>, vector<128x128xbf16>
    %cst_28 = arith.constant dense<0.000000e+00> : vector<8x128xf32>
    %56 = tpu.matmul %54, %55, %cst_28 {dimension_numbers = #tpu.dot_dimension_numbers<[1], [0], [0], [1], [0, 0, 1, 1], [], []>} : vector<8x128xbf16>, vector<128x128xbf16>, vector<8x128xf32> -> vector<8x128xf32>
    %c0_29 = arith.constant 0 : index
    %c0_30 = arith.constant 0 : index
    %57 = vector.load %arg8[%c0_29, %c0_30] : memref<1x128xf32, #tpu.memory_space<vmem>>, vector<1x128xf32>
    %58 = vector.broadcast %57 : vector<1x128xf32> to vector<8x128xf32>
    %59 = arith.addf %56, %58 : vector<8x128xf32>
    %c0_31 = arith.constant 0 : index
    %c0_32 = arith.constant 0 : index
    %60 = vector.load %arg9[%c0_31, %c0_32] : memref<8x128xf32, #tpu.memory_space<vmem>>, vector<8x128xf32>
    tpu.vector_store %arg9[%c0_31, %c0_32], %59 {strides = array<i32>} : memref<8x128xf32, #tpu.memory_space<vmem>>, vector<8x128xf32>,
    return
  }
}

</mosaic_0001>

<bundles_post_ra>
// kernel: _forward_impl.1
= control target key start
LH: loop header
LB: loop body
LE: loop exit
PB: predicated region body
PF: predicated region fallthrough
CT: control target
= control target key end

     0   :  { %14 = vsyncpa [#allocation3], 0  ;;  %s861_s0 = inlined_call_operand.vmem [shape: bf16[8,128], index: 0, kind: input, shape index: {}]   ;;  %s862_s1 = inlined_call_operand.hbm [shape: bf16[128,128], index: 1, kind: input, shape index: {}]   ;;  %s863_s2 = inlined_call_operand.vmem [shape: f32[1,128], index: 2, kind: input, shape index: {}, may-alias: {2,5}]   ;;  %s864_s3 = inlined_call_operand.vmem [shape: f32[1,128], index: 3, kind: input, shape index: {}, may-alias: {3,6}]   ;;  %s865_s4 = inlined_call_operand.hbm [shape: bf16[128,128], index: 4, kind: input, shape index: {}]   ;;  %s866_s5 = inlined_call_operand.vmem [shape: f32[1,128], index: 5, kind: input, shape index: {}, may-alias: {2,5}]   ;;  %s867_s6 = inlined_call_operand.vmem [shape: f32[1,128], index: 6, kind: input, shape index: {}, may-alias: {3,6}]   ;;  %s868_s7 = inlined_call_operand.vmem [shape: bf16[128,128], index: 7, kind: input, shape index: {}]   ;;  %s869_s8 = inlined_call_operand.vmem [shape: f32[1,128], index: 8, kind: input, shape index: {}]   ;;  %s870_s9 = inlined_call_operand.hbm [shape: f32[8,128], index: 9, kind: output, shape index: {}]  }
   0x1   :  { %15 = vsyncpa [#allocation6], 0 }
   0x2   :  { %16 = vsyncpa [#allocation4], 0  ;;  %s696_s30 = smov [#allocation2]   ;;  %s624_s13 = scalar_lea.hbm %s862_s1, 1024 }
   0x3   :  { %s24_s10 = sshll.u32 %s696_s30, 4  ;;  %p625_p0 = scmp.ne.s32.totalorder %s862_s1, %s624_s13  ;;  %s25_s10 = int_to_ptr.vmem [resolvable:$true] %s24_s10 }
   0x4   :  { %p628_p1 = scmp.lt.u32.totalorder %s624_s13, %s862_s1 }
   0x6   :  { %p630_p2 = pnand %p628_p1, %p625_p0 }
   0x8   :  { %633 = shalt.err (!%p630_p2)
}
   0x9   :  { %s634_s18 = scalar_lea.vmem %s25_s10, 1024  ;;  %p639_p4 = scmp.lt.s32.totalorder %s25_s10, %s25_s10 }
   0xa   :  { %p635_p3 = scmp.ne.s32.totalorder %s25_s10, %s634_s18  ;;  %p640_p5 = scmp.lt.s32.totalorder %s634_s18, %s634_s18 }
   0xc   :  { %p641_p6 = por %p640_p5, %p639_p4 }
   0xe   :  { %p642_p7 = pnand %p641_p6, %p635_p3 }
  0x10   :  { %645 = shalt.err (!%p642_p7)
}
  0x11   :  { %s697_s19 = smov 64   ;;  %s698_s20 = smov 4  }
  0x12   :  { %30 = dma.hbm_to_vmem [thread:$0]  %s862_s1, 1024, %s25_s10, [#allocation3], %s697_s19, %s697_s19, %s698_s20  }
  0x13   :  { %s699_s23 = smov [#allocation5]   ;;  %s646_s27 = scalar_lea.hbm %s865_s4, 1024 }
  0x14   :  { %s40_s24 = sshll.u32 %s699_s23, 4  ;;  %p647_p8 = scmp.ne.s32.totalorder %s865_s4, %s646_s27  ;;  %s41_s24 = int_to_ptr.vmem [resolvable:$true] %s40_s24 }
  0x15   :  { %p650_p9 = scmp.lt.u32.totalorder %s646_s27, %s865_s4 }
  0x17   :  { %p652_p10 = pnand %p650_p9, %p647_p8 }
  0x19   :  { %655 = shalt.err (!%p652_p10)
}
  0x1a   :  { %s656_s12 = scalar_lea.vmem %s41_s24, 1024  ;;  %p661_p12 = scmp.lt.s32.totalorder %s41_s24, %s41_s24 }
  0x1b   :  { %p657_p11 = scmp.ne.s32.totalorder %s41_s24, %s656_s12  ;;  %p662_p13 = scmp.lt.s32.totalorder %s656_s12, %s656_s12 }
  0x1d   :  { %p663_p0 = por %p662_p13, %p661_p12 }
  0x1f   :  { %p664_p1 = pnand %p663_p0, %p657_p11 }
  0x21   :  { %667 = shalt.err (!%p664_p1)
}
  0x22   :  { %46 = dma.hbm_to_vmem [thread:$0]  %s865_s4, 1024, %s41_s24, [#allocation6], %s697_s19, %s697_s19, %s698_s20  }
  0x23   :  { %690 = dma.done.wait [#allocation3], 1024  }
  0x24   :  { %691 = vsyncadd [#allocation3], 4294966272 }
  0x25   :  { %692 = dma.done.wait [#allocation6], 1024  }
  0x26   :  { %693 = vsyncadd [#allocation6], 4294966272  ;;  %v700_v0 = vmov 0.0   ;;  %vm701_vm0 = vmmov 0   ;;  %v596_v1 = vld [vmem:[#allocation2] sm:$0xff]   ;;  %v597_v2 = vld [vmem:[#allocation2 + $0x8] sm:$0xff]  }
  0x27   :  { %529 = vmatprep.subr.bf16.mxu0 %v700_v0  ;;  %545 = vmatprep.mubr.msk.bf16.mxu0 %vm701_vm0, %v700_v0  ;;  %v598_v3 = vld [vmem:[#allocation2 + $0x10] sm:$0xff]   ;;  %v599_v4 = vld [vmem:[#allocation2 + $0x18] sm:$0xff]   ;;  %v600_v5 = vld [vmem:[#allocation2 + $0x20] sm:$0xff]   ;;  %s702_s13 = smov [#allocation7]  }
  0x28   :  { %549 = vmatprep.subr.bf16.mxu1 %v700_v0  ;;  %565 = vmatprep.mubr.msk.bf16.mxu1 %vm701_vm0, %v700_v0  ;;  %v601_v6 = vld [vmem:[#allocation2 + $0x28] sm:$0xff]   ;;  %v602_v7 = vld [vmem:[#allocation2 + $0x30] sm:$0xff]   ;;  %v603_v8 = vld [vmem:[#allocation2 + $0x38] sm:$0xff]  }
  0x29   :  { %530 = vmatpush3.bf16.msra.mxu0 %v596_v1  ;;  %v62_v9 = vld [vmem:[%s861_s0] sm:$0xf]  ;;  %v605_v11 = vld [vmem:[#allocation5 + $0x8] sm:$0xff]   ;;  %v606_v12 = vld [vmem:[#allocation5 + $0x10] sm:$0xff]   ;;  %s463_s0 = sshll.u32 %s702_s13, 4  ;;  %s464_s0 = int_to_ptr.vmem [resolvable:$true] %s463_s0 }
  0x2a   :  { %531 = vmatprep.subr.bf16.mxu0 %v700_v0  ;;  %v604_v10 = vld [vmem:[#allocation5] sm:$0xff]   ;;  %v607_v13 = vld [vmem:[#allocation5 + $0x18] sm:$0xff]   ;;  %v609_v15 = vld [vmem:[#allocation5 + $0x28] sm:$0xff]   ;;  %p673_p3 = scmp.lt.s32.totalorder %s464_s0, %s464_s0 }
  0x2b   :  { %550 = vmatpush3.bf16.msra.mxu1 %v604_v10  ;;  %v608_v14 = vld [vmem:[#allocation5 + $0x20] sm:$0xff]   ;;  %v610_v16 = vld [vmem:[#allocation5 + $0x30] sm:$0xff]   ;;  %v611_v17 = vld [vmem:[#allocation5 + $0x38] sm:$0xff]  }
  0x2c   :  { %551 = vmatprep.subr.bf16.mxu1 %v700_v0  ;;  %v481_v40 = vld [vmem:[%s863_s2] ss:$0 sm:$0xff]  ;;  %v613_v48 = vld [vmem:[%s868_s7 + $0x8] sm:$0xff]   ;;  %v614_v49 = vld [vmem:[%s868_s7 + $0x10] sm:$0xff]  }
  0x2d   :  { %532 = vmatpush3.bf16.msra.mxu0 %v597_v2  ;;  %v482_v42 = vld [vmem:[%s864_s3] ss:$0 sm:$0xff]  ;;  %v615_v50 = vld [vmem:[%s868_s7 + $0x18] sm:$0xff]   ;;  %v617_v52 = vld [vmem:[%s868_s7 + $0x28] sm:$0xff]  }
  0x2e   :  { %533 = vmatprep.subr.bf16.mxu0 %v700_v0  ;;  %v612_v47 = vld [vmem:[%s868_s7] sm:$0xff]   ;;  %v618_v53 = vld [vmem:[%s868_s7 + $0x30] sm:$0xff]   ;;  %v619_v54 = vld [vmem:[%s868_s7 + $0x38] sm:$0xff]  }
  0x2f   :  { %552 = vmatpush3.bf16.msra.mxu1 %v605_v11  ;;  %v616_v51 = vld [vmem:[%s868_s7 + $0x20] sm:$0xff]  }
  0x30   :  { %553 = vmatprep.subr.bf16.mxu1 %v700_v0 }
  0x31   :  { %534 = vmatpush3.bf16.msra.mxu0 %v598_v3 }
  0x32   :  { %535 = vmatprep.subr.bf16.mxu0 %v700_v0 }
  0x33   :  { %554 = vmatpush3.bf16.msra.mxu1 %v606_v12 }
  0x34   :  { %555 = vmatprep.subr.bf16.mxu1 %v700_v0 }
  0x35   :  { %536 = vmatpush3.bf16.msra.mxu0 %v599_v4 }
  0x36   :  { %537 = vmatprep.subr.bf16.mxu0 %v700_v0 }
  0x37   :  { %556 = vmatpush3.bf16.msra.mxu1 %v607_v13  ;;  %v491_v13 = vld [vmem:[%s866_s5] ss:$0 sm:$0xff]  ;;  %s668_s5 = scalar_lea.vmem %s464_s0, 128 }
  0x38   :  { %557 = vmatprep.subr.bf16.mxu1 %v700_v0  ;;  %p669_p2 = scmp.ne.s32.totalorder %s464_s0, %s668_s5  ;;  %p674_p4 = scmp.lt.s32.totalorder %s668_s5, %s668_s5 }
  0x39   :  { %538 = vmatpush3.bf16.msra.mxu0 %v600_v5 }
  0x3a   :  { %539 = vmatprep.subr.bf16.mxu0 %v700_v0  ;;  %p675_p5 = por %p674_p4, %p673_p3 }
  0x3b   :  { %558 = vmatpush3.bf16.msra.mxu1 %v608_v14 }
  0x3c   :  { %559 = vmatprep.subr.bf16.mxu1 %v700_v0  ;;  %p676_p6 = pnand %p675_p5, %p669_p2 }
  0x3d   :  { %540 = vmatpush3.bf16.msra.mxu0 %v601_v6 }
  0x3e   :  { %541 = vmatprep.subr.bf16.mxu0 %v700_v0 }
  0x3f   :  { %560 = vmatpush3.bf16.msra.mxu1 %v609_v15  ;;  %v492_v15 = vld [vmem:[%s867_s6] ss:$0 sm:$0xff] }
  0x40   :  { %561 = vmatprep.subr.bf16.mxu1 %v700_v0 }
  0x41   :  { %542 = vmatpush3.bf16.msra.mxu0 %v602_v7 }
  0x42   :  { %543 = vmatprep.subr.bf16.mxu0 %v700_v0 }
  0x43   :  { %562 = vmatpush3.bf16.msra.mxu1 %v610_v16 }
  0x44   :  { %563 = vmatprep.subr.bf16.mxu1 %v700_v0 }
  0x45   :  { %544 = vmatpush3.bf16.msra.mxu0 %v603_v8 }
  0x46   :  { %569 = vmatprep.subr.bf16.mxu0 %v700_v0 }
  0x47   :  { %564 = vmatpush3.bf16.msra.mxu1 %v611_v17 }
  0x48   :  { %546 = vmatmul.mubr.bf16.vlgmr.msra.gmra.mrb[0].mxu0 %v62_v9 }
  0x49   :  { %585 = vmatprep.mubr.msk.bf16.mxu0 %vm701_vm0, %v700_v0  ;;  %570 = vmatpush3.bf16.msra.mxu0 %v612_v47 }
  0x4a   :  { %571 = vmatprep.subr.bf16.mxu0 %v700_v0 }
  0x4d   :  { %572 = vmatpush3.bf16.msra.mxu0 %v613_v48 }
  0x4e   :  { %573 = vmatprep.subr.bf16.mxu0 %v700_v0 }
  0x51   :  { %574 = vmatpush3.bf16.msra.mxu0 %v614_v49 }
  0x52   :  { %575 = vmatprep.subr.bf16.mxu0 %v700_v0 }
  0x55   :  { %576 = vmatpush3.bf16.msra.mxu0 %v615_v50 }
  0x56   :  { %577 = vmatprep.subr.bf16.mxu0 %v700_v0 }
  0x59   :  { %578 = vmatpush3.bf16.msra.mxu0 %v616_v51 }
  0x5a   :  { %579 = vmatprep.subr.bf16.mxu0 %v700_v0 }
  0x5d   :  { %580 = vmatpush3.bf16.msra.mxu0 %v617_v52 }
  0x5e   :  { %581 = vmatprep.subr.bf16.mxu0 %v700_v0 }
  0x61   :  { %582 = vmatpush3.bf16.msra.mxu0 %v618_v53 }
  0x62   :  { %583 = vmatprep.subr.bf16.mxu0 %v700_v0 }
  0x65   :  { %584 = vmatpush3.bf16.msra.mxu0 %v619_v54 }
 0x11b   :  { %v161_v18 = vpop.f32.mrb[0].mxu0 }
 0x11c   :  { %v167_v19 = vrot.slane %v161_v18, 4  ;;  %v547_v20 = vpop.f32.mrb[1].mxu0 }
 0x11d   :  { %v164_v21 = vpop.f32.mrb[2].mxu0  ;;  %v493_v20 = vld [vmem:[%s869_s8] ss:$0 sm:$0xff] }
 0x11e   :  { %v168_v22 = vadd.f32 %v167_v19, %v161_v18  ;;  %v548_v23 = vpop.f32.mrb[3].mxu0 }
 0x120   :  { %v169_v24 = vrot.slane %v168_v22, 2 }
 0x122   :  { %v170_v25 = vadd.f32 %v169_v24, %v168_v22 }
 0x124   :  { %v171_v26 = vrot.slane %v170_v25, 1 }
 0x126   :  { %v172_v27 = vadd.f32 %v171_v26, %v170_v25 }
 0x128   :  { %v173_v28 = vmul.f32 0.125, %v172_v27 }
 0x12a   :  { %v174_v29 = vsub.f32 %v161_v18, %v173_v28 }
 0x12c   :  { %v175_v30 = vmul.f32 %v174_v29, %v174_v29 }
 0x12e   :  { %v176_v31 = vrot.slane %v175_v30, 4 }
 0x130   :  { %v177_v32 = vadd.f32 %v176_v31, %v175_v30 }
 0x132   :  { %v178_v33 = vrot.slane %v177_v32, 2 }
 0x134   :  { %v179_v34 = vadd.f32 %v178_v33, %v177_v32 }
 0x136   :  { %v180_v35 = vrot.slane %v179_v34, 1 }
 0x138   :  { %v181_v36 = vadd.f32 %v180_v35, %v179_v34 }
 0x13a   :  { %v182_v37 = vmul.f32 0.125, %v181_v36 }
 0x13c   :  { %v183_v38 = vadd.f32 1e-05, %v182_v37 }
 0x13e   :  { %620 = vrsqrt.f32 %v183_v38 }
 0x148   :  { %v621_v39 = vpop.eup %620 }
 0x149   :  { %v185_v41 = vmul.f32 %v621_v39, %v174_v29 }
 0x14b   :  { %v193_v43 = vmul.f32 %v481_v40, %v185_v41 }
 0x14d   :  { %v201_v44 = vadd.f32 %v482_v42, %v193_v43 }
 0x14f   :  { %v202_v45 = vmax.f32 %v201_v44, 0.0 }
 0x151   :  { %v203_v46 = vpack.c.bf16 %v202_v45, %v202_v45 }
 0x153   :  { %566 = vmatmul.mubr.bf16.vlgmr.msra.gmra.mrb[0].mxu1 %v203_v46 }
 0x226   :  { %v302_v55 = vpop.f32.mrb[0].mxu1 }
 0x227   :  { %v308_v56 = vrot.slane %v302_v55, 4  ;;  %v567_v57 = vpop.f32.mrb[1].mxu1 }
 0x228   :  { %v305_v58 = vpop.f32.mrb[2].mxu1 }
 0x229   :  { %v309_v59 = vadd.f32 %v308_v56, %v302_v55  ;;  %v568_v60 = vpop.f32.mrb[3].mxu1 }
 0x22b   :  { %v310_v61 = vrot.slane %v309_v59, 2 }
 0x22d   :  { %v311_v62 = vadd.f32 %v310_v61, %v309_v59 }
 0x22f   :  { %v312_v63 = vrot.slane %v311_v62, 1 }
 0x231   :  { %v313_v1 = vadd.f32 %v312_v63, %v311_v62 }
 0x233   :  { %v314_v2 = vmul.f32 0.125, %v313_v1 }
 0x235   :  { %v315_v3 = vsub.f32 %v302_v55, %v314_v2 }
 0x237   :  { %v316_v4 = vmul.f32 %v315_v3, %v315_v3 }
 0x239   :  { %v317_v5 = vrot.slane %v316_v4, 4 }
 0x23b   :  { %v318_v6 = vadd.f32 %v317_v5, %v316_v4 }
 0x23d   :  { %v319_v7 = vrot.slane %v318_v6, 2 }
 0x23f   :  { %v320_v8 = vadd.f32 %v319_v7, %v318_v6 }
 0x241   :  { %v321_v9 = vrot.slane %v320_v8, 1 }
 0x243   :  { %v322_v0 = vadd.f32 %v321_v9, %v320_v8 }
 0x245   :  { %v323_v10 = vmul.f32 0.125, %v322_v0 }
 0x247   :  { %v324_v11 = vadd.f32 1e-05, %v323_v10 }
 0x249   :  { %622 = vrsqrt.f32 %v324_v11 }
 0x253   :  { %v623_v12 = vpop.eup %622 }
 0x254   :  { %v326_v14 = vmul.f32 %v623_v12, %v315_v3 }
 0x256   :  { %v334_v16 = vmul.f32 %v491_v13, %v326_v14 }
 0x258   :  { %v342_v17 = vadd.f32 %v492_v15, %v334_v16 }
 0x25a   :  { %v343_v18 = vmax.f32 %v342_v17, 0.0 }
 0x25c   :  { %v344_v19 = vpack.c.bf16 %v343_v18, %v343_v18 }
 0x25e   :  { %586 = vmatmul.mubr.bf16.vlgmr.msra.gmra.mrb[4].mxu0 %v344_v19 }
 0x331   :  { %v450_v21 = vpop.f32.mrb[4].mxu0 }
 0x332   :  { %v451_v22 = vadd.f32 %v493_v20, %v450_v21  ;;  %v587_v23 = vpop.f32.mrb[5].mxu0 }
 0x333   :  { %v453_v24 = vpop.f32.mrb[6].mxu0 }
 0x334   :  { %456 = vst [vmem:[#allocation7] sm:$0xff] %v451_v22  ;;  %v588_v25 = vpop.f32.mrb[7].mxu0 }
 0x335   :  { %679 = shalt.err (!%p676_p6)
}
 0x336   :  { %s680_s8 = scalar_lea.hbm %s870_s9, 128 }
 0x337   :  { %p681_p7 = scmp.ne.s32.totalorder %s870_s9, %s680_s8  ;;  %p684_p8 = scmp.lt.u32.totalorder %s680_s8, %s870_s9 }
 0x339   :  { %p686_p9 = pnand %p684_p8, %p681_p7 }
 0x33b   :  { %689 = shalt.err (!%p686_p9)
}
 0x33c   :  { %466 = dma.vmem_to_hbm [thread:$0]  %s464_s0, 128, %s870_s9, [#allocation4]  }
 0x33d   :  { %694 = dma.done.wait [#allocation4], 128  }
 0x33e   :  { %695 = vsyncadd [#allocation4], 4294967168 }
 0x33f   :  { %470 = vsyncpa [#allocation3], 1 }
 0x340   :  { %471 = vsyncpa [#allocation6], 1 }
 0x341   :  { %472 = vsyncpa [#allocation4], 1 }

</bundles_post_ra>
